<compile_context>
chip_gen: v7x
topology: tpu7x:2x2x1
jax: 0.10.0
libtpu: 0.0.40
codegen_flags: <defaults>
</compile_context>

<pallas_src>
import functools

import jax
import jax.numpy as jnp
from jax.experimental import pallas as pl
from jax.experimental.pallas import tpu as pltpu


def _round_up(x, m):
    return ((x + m - 1) // m) * m


def _num_tensorcores():
    """Heuristic: dual-TensorCore chips (v4/v5p megacore, v7x) vs single-TC (v5e/v6e)."""
    try:
        kind = jax.devices()[0].device_kind.lower()
    except Exception:
        return 1
    return 2 if any(t in kind for t in ("v4", "v5p", "v7")) else 1


def _vmem_cap_bytes():
    """~75% of physical VMEM (leaves headroom for compiler scratch); 48 MiB fallback."""
    try:
        return int(pltpu.get_tpu_info().vmem_capacity_bytes) * 3 // 4
    except Exception:
        return 48 << 20


def _choose_tile(B, tm, ncores):
    """Largest batch tile <= tm covering B/ncores rows, sublane-aligned (multiple of 8)."""
    tm = max(8, (tm // 8) * 8)
    per_core = -(-B // max(ncores, 1))          # ceil-div
    return max(8, min(tm, _round_up(per_core, 8)))


# ---------------------------------------------------------------------------
# Kernel
# ---------------------------------------------------------------------------
def class_block_kernel(x_ref, w1_ref, b1_ref, w2_ref, b2_ref, *out_refs, return_f):
    out_ref = out_refs[0]

    # ---- fused Linear1 + BatchNorm (pre-folded into W1/b1): (tm, D) @ (D, L) + (1, L)
    x = x_ref[...].astype(jnp.bfloat16)          # cast in-kernel; x arrives as f32
    h = jnp.dot(x, w1_ref[...], preferred_element_type=jnp.float32)
    h = h + b1_ref[...]

    # relu=False -> no LeakyReLU. Dropout at inference -> identity.
    if return_f:
        out_refs[1][...] = h.astype(out_refs[1].dtype)

    # ---- Linear 2 (classifier): (tm, L) @ (L, C) + (1, C)
    y = jnp.dot(h.astype(jnp.bfloat16), w2_ref[...],
                preferred_element_type=jnp.float32)
    out_ref[...] = (y + b2_ref[...]).astype(out_ref.dtype)


# ---------------------------------------------------------------------------
# One-time parameter preparation (fold BN, pad lane dims, cast to bf16)
# ---------------------------------------------------------------------------
def prepare_class_block_params(params, eps=1e-5):
    D, L = params["w1"].shape
    C = params["w2"].shape[1]

    # Fold BatchNorm1d (eval) + b1 into Linear1.
    scale = params["gamma"] * jax.lax.rsqrt(params["var"] + eps)           # (1, L)
    w1f = params["w1"] * scale                                             # (D, L)
    b1f = (params["b1"] - params["mean"]) * scale + params["beta"]         # (1, L)

    # Lane-dense padding of the hidden/class dims (weights prepared once, so free per call).
    L_pad = _round_up(L, 128)
    C_pad = _round_up(C, 128)

    w1p = jnp.zeros((D, L_pad), jnp.bfloat16).at[:, :L].set(w1f.astype(jnp.bfloat16))
    b1p = jnp.zeros((1, L_pad), jnp.float32).at[:, :L].set(b1f)
    w2p = jnp.zeros((L_pad, C_pad), jnp.bfloat16).at[:L, :C].set(
        params["w2"].astype(jnp.bfloat16))
    b2p = jnp.zeros((1, C_pad), jnp.float32).at[:, :C].set(params["b2"])

    return dict(w1=w1p, b1=b1p, w2=w2p, b2=b2p, dims=(D, L, C))


# ---------------------------------------------------------------------------
# Forward wrapper
# ---------------------------------------------------------------------------
def class_block_forward(x, prepared, *, tm=512, return_f=False,
                        logits_dtype=jnp.float32, feature_dtype=jnp.bfloat16):
    """x: (B, input_dim) float32.  prepared: output of prepare_class_block_params."""
    B, D = x.shape
    Dp, L, C = prepared["dims"]
    assert D == Dp, f"input_dim mismatch: {D} vs {Dp}"
    L_pad = prepared["w1"].shape[1]
    C_pad = prepared["w2"].shape[1]

    # ---- Generation-aware batch tiling ----
    ncores = _num_tensorcores()
    tile = _choose_tile(B, tm, ncores)
    B_pad = _round_up(B, tile)
    if B_pad != B:                                # pad batch only when needed
        x = jnp.pad(x, ((0, B_pad - B), (0, 0)))
    grid = (B_pad // tile,)

    # ---- Specs: x tiled over batch; weights/biases grid-invariant & single-buffered ----
    const_spec = lambda shape: pl.BlockSpec(shape, lambda i: (0, 0),
                                            pipeline_mode=pl.Buffered(1))
    in_specs = [
        pl.BlockSpec((tile, D), lambda i: (i, 0)),    # x tile (f32, cast in-kernel)
        const_spec((D, L_pad)),                       # folded W1
        const_spec((1, L_pad)),                       # folded b1
        const_spec((L_pad, C_pad)),                   # W2
        const_spec((1, C_pad)),                       # b2
    ]
    out_specs = [pl.BlockSpec((tile, C_pad), lambda i: (i, 0))]
    out_shape = [jax.ShapeDtypeStruct((B_pad, C_pad), logits_dtype)]
    if return_f:
        out_specs.append(pl.BlockSpec((tile, L_pad), lambda i: (i, 0)))
        out_shape.append(jax.ShapeDtypeStruct((B_pad, L_pad), feature_dtype))

    # ---- Tight VMEM estimate (single-buffered weights, double-buffered tiles) ----
    out_sz = jnp.dtype(logits_dtype).itemsize
    feat_sz = jnp.dtype(feature_dtype).itemsize
    est = (2 * tile * D * 4                              # x tiles (f32, double-buffered)
           + (D * L_pad + L_pad * C_pad) * 2             # weights (bf16, single-buffered)
           + (L_pad + C_pad) * 4                         # biases (f32)
           + 2 * tile * C_pad * out_sz                   # logits tiles
           + (2 * tile * L_pad * feat_sz if return_f else 0))
    vmem_limit = min(_vmem_cap_bytes(), est + (8 << 20))

    flops = 2 * B_pad * (D * L_pad + L_pad * C_pad)
    bytes_accessed = (B_pad * D * 4
                      + (D * L_pad + L_pad * C_pad) * 2
                      + (L_pad + C_pad) * 4
                      + B_pad * C_pad * out_sz
                      + (B_pad * L_pad * feat_sz if return_f else 0))

    results = pl.pallas_call(
        functools.partial(class_block_kernel, return_f=return_f),
        grid_spec=pl.GridSpec(grid=grid, in_specs=in_specs, out_specs=out_specs),
        out_shape=out_shape,
        compiler_params=pltpu.CompilerParams(
            dimension_semantics=("parallel",),
            vmem_limit_bytes=int(vmem_limit)),
        cost_estimate=pl.CostEstimate(
            flops=flops, transcendentals=0, bytes_accessed=bytes_accessed),
    )(x, prepared["w1"], prepared["b1"], prepared["w2"], prepared["b2"])

    out = results[0][:B, :C]
    if return_f:
        feat = results[1][:B, :L]
        return [out, feat]
    return out


# ---------------------------------------------------------------------------
# Init / reference (for testing)
# ---------------------------------------------------------------------------
def init_params(key, input_dim, linear, class_num):
    """Deterministic init mimicking weights_init_kaiming / weights_init_classifier."""
    k1, k2, k3, _ = jax.random.split(key, 4)
    # Linear1: kaiming_normal_ fan_out -> std = sqrt(2 / linear)
    w1 = jax.random.normal(k1, (input_dim, linear), jnp.float32) * jnp.sqrt(2.0 / linear)
    b1 = jnp.zeros((1, linear), jnp.float32)
    # BatchNorm1d: weight ~ N(1.0, 0.02), bias = 0; running stats = (0, 1)
    gamma = 1.0 + 0.02 * jax.random.normal(k2, (1, linear), jnp.float32)
    beta = jnp.zeros((1, linear), jnp.float32)
    mean = jnp.zeros((1, linear), jnp.float32)
    var = jnp.ones((1, linear), jnp.float32)
    # Classifier Linear: normal_(std=0.001), bias = 0
    w2 = 0.001 * jax.random.normal(k3, (linear, class_num), jnp.float32)
    b2 = jnp.zeros((1, class_num), jnp.float32)
    return dict(w1=w1, b1=b1, gamma=gamma, beta=beta, mean=mean, var=var,
                w2=w2, b2=b2)


def reference_forward(x, p, eps=1e-5):
    h = x @ p["w1"] + p["b1"]
    h = (h - p["mean"]) / jnp.sqrt(p["var"] + eps) * p["gamma"] + p["beta"]
    return h @ p["w2"] + p["b2"], h


if __name__ == "__main__":
    key = jax.random.PRNGKey(0)
    kx, kp = jax.random.split(key)

    B, input_dim, linear, class_num = 16, 64, 32, 16
    x = jax.random.normal(kx, (B, input_dim), jnp.float32)
    params = init_params(kp, input_dim, linear, class_num)

    # One-time parameter preparation (BN fold + pad + bf16 cast).
    prepared = prepare_class_block_params(params)

    # return_f=False path (logits only)
    out = class_block_forward(x, prepared)
    out = jax.block_until_ready(out)

    # return_f=True path (logits + pre-classifier feature, feature in bf16)
    out2, feat = class_block_forward(x, prepared, return_f=True)
    out2 = jax.block_until_ready(out2)

    ref_y, ref_h = reference_forward(x, params)
    assert out.shape == (B, class_num)
    assert feat.shape == (B, linear)
    # bf16 matmul inputs with f32 accumulation -> loosened tolerance vs f32 reference.
    assert jnp.allclose(out, ref_y, atol=2e-3, rtol=5e-2), "logits mismatch vs reference"
    assert jnp.allclose(out2, ref_y, atol=2e-3, rtol=5e-2), "logits (return_f) mismatch"
    assert jnp.allclose(feat.astype(jnp.float32), ref_h, atol=5e-2, rtol=5e-2), \
        "feature mismatch vs reference"

    # TODO(synk): Dropout (droprate>0) in training mode would need pltpu.prng_* masking;
    # inference-mode semantics (identity) are implemented here.
    print("KERNEL_OK")
</pallas_src>

<mosaic_0001>
module attributes {stable_mosaic.version = 11 : i64} {
  func.func @class_block_kernel(%arg0: i32, %arg1: memref<16x64xf32, #tpu.memory_space<vmem>>, %arg2: memref<64x128xbf16, #tpu.memory_space<vmem>>, %arg3: memref<1x128xf32, #tpu.memory_space<vmem>>, %arg4: memref<128x128xbf16, #tpu.memory_space<vmem>>, %arg5: memref<1x128xf32, #tpu.memory_space<vmem>>, %arg6: memref<16x128xf32, #tpu.memory_space<vmem>>) attributes {dimension_semantics = [#tpu.dimension_semantics<parallel>], iteration_bounds = array<i64: 1>, scalar_prefetch = 0 : i64, scratch_operands = 0 : i64, tpu.core_type = #tpu.core_type<tc>, window_params = [{transform_indices = @transform_0, window_bounds = array<i64: 16, 64>}, {pipeline_mode = #tpu.pipeline_mode<synchronous>, transform_indices = @transform_1, window_bounds = array<i64: 64, 128>}, {pipeline_mode = #tpu.pipeline_mode<synchronous>, transform_indices = @transform_2, window_bounds = array<i64: 1, 128>}, {pipeline_mode = #tpu.pipeline_mode<synchronous>, transform_indices = @transform_3, window_bounds = array<i64: 128, 128>}, {pipeline_mode = #tpu.pipeline_mode<synchronous>, transform_indices = @transform_4, window_bounds = array<i64: 1, 128>}, {transform_indices = @transform_5, window_bounds = array<i64: 16, 128>}]} {
    %c0 = arith.constant 0 : index
    %c0_0 = arith.constant 0 : index
    %0 = vector.load %arg1[%c0, %c0_0] : memref<16x64xf32, #tpu.memory_space<vmem>>, vector<16x64xf32>
    %1 = arith.truncf %0 : vector<16x64xf32> to vector<16x64xbf16>
    %c0_1 = arith.constant 0 : index
    %c0_2 = arith.constant 0 : index
    %2 = vector.load %arg2[%c0_1, %c0_2] : memref<64x128xbf16, #tpu.memory_space<vmem>>, vector<64x128xbf16>
    %cst = arith.constant dense<0.000000e+00> : vector<16x128xf32>
    %3 = tpu.matmul %1, %2, %cst {dimension_numbers = #tpu.dot_dimension_numbers<[1], [0], [0], [1], [0, 0, 1, 1], [], []>} : vector<16x64xbf16>, vector<64x128xbf16>, vector<16x128xf32> -> vector<16x128xf32>
    %c0_3 = arith.constant 0 : index
    %c0_4 = arith.constant 0 : index
    %4 = vector.load %arg3[%c0_3, %c0_4] : memref<1x128xf32, #tpu.memory_space<vmem>>, vector<1x128xf32>
    %5 = vector.broadcast %4 : vector<1x128xf32> to vector<16x128xf32>
    %6 = arith.addf %3, %5 : vector<16x128xf32>
    %7 = arith.truncf %6 : vector<16x128xf32> to vector<16x128xbf16>
    %c0_5 = arith.constant 0 : index
    %c0_6 = arith.constant 0 : index
    %8 = vector.load %arg4[%c0_5, %c0_6] : memref<128x128xbf16, #tpu.memory_space<vmem>>, vector<128x128xbf16>
    %cst_7 = arith.constant dense<0.000000e+00> : vector<16x128xf32>
    %9 = tpu.matmul %7, %8, %cst_7 {dimension_numbers = #tpu.dot_dimension_numbers<[1], [0], [0], [1], [0, 0, 1, 1], [], []>} : vector<16x128xbf16>, vector<128x128xbf16>, vector<16x128xf32> -> vector<16x128xf32>
    %c0_8 = arith.constant 0 : index
    %c0_9 = arith.constant 0 : index
    %10 = vector.load %arg5[%c0_8, %c0_9] : memref<1x128xf32, #tpu.memory_space<vmem>>, vector<1x128xf32>
    %11 = vector.broadcast %10 : vector<1x128xf32> to vector<16x128xf32>
    %12 = arith.addf %9, %11 : vector<16x128xf32>
    %c0_10 = arith.constant 0 : index
    %c0_11 = arith.constant 0 : index
    %13 = vector.load %arg6[%c0_10, %c0_11] : memref<16x128xf32, #tpu.memory_space<vmem>>, vector<16x128xf32>
    tpu.vector_store %arg6[%c0_10, %c0_11], %12 {strides = array<i32>} : memref<16x128xf32, #tpu.memory_space<vmem>>, vector<16x128xf32>,
    return
  }
  func.func @transform_0(%arg0: i32) -> (i32, i32) {
    %c0_i32 = arith.constant 0 : i32
    %c0_i32_0 = arith.constant 0 : i32
    return %arg0, %c0_i32 : i32, i32
  }
  func.func @transform_1(%arg0: i32) -> (i32, i32) {
    %c0_i32 = arith.constant 0 : i32
    %c0_i32_0 = arith.constant 0 : i32
    %c0_i32_1 = arith.constant 0 : i32
    return %c0_i32, %c0_i32_0 : i32, i32
  }
  func.func @transform_2(%arg0: i32) -> (i32, i32) {
    %c0_i32 = arith.constant 0 : i32
    %c0_i32_0 = arith.constant 0 : i32
    %c0_i32_1 = arith.constant 0 : i32
    return %c0_i32, %c0_i32_0 : i32, i32
  }
  func.func @transform_3(%arg0: i32) -> (i32, i32) {
    %c0_i32 = arith.constant 0 : i32
    %c0_i32_0 = arith.constant 0 : i32
    %c0_i32_1 = arith.constant 0 : i32
    return %c0_i32, %c0_i32_0 : i32, i32
  }
  func.func @transform_4(%arg0: i32) -> (i32, i32) {
    %c0_i32 = arith.constant 0 : i32
    %c0_i32_0 = arith.constant 0 : i32
    %c0_i32_1 = arith.constant 0 : i32
    return %c0_i32, %c0_i32_0 : i32, i32
  }
  func.func @transform_5(%arg0: i32) -> (i32, i32) {
    %c0_i32 = arith.constant 0 : i32
    %c0_i32_0 = arith.constant 0 : i32
    return %arg0, %c0_i32 : i32, i32
  }
}

</mosaic_0001>

<bundles_post_ra>
// kernel: tpu_custom_call.1
= control target key start
LH: loop header
LB: loop body
LE: loop exit
PB: predicated region body
PF: predicated region fallthrough
CT: control target
= control target key end

     0   :  { %10 = vsyncpa [#allocation3], 0  ;;  %s566_s0 = inlined_call_operand.hbm [shape: f32[16,64], index: 0, kind: input, shape index: {}]   ;;  %s567_s1 = inlined_call_operand.hbm [shape: bf16[64,128], index: 1, kind: input, shape index: {}]   ;;  %s568_s2 = inlined_call_operand.vmem [shape: f32[1,128], index: 2, kind: input, shape index: {}]   ;;  %s569_s3 = inlined_call_operand.hbm [shape: bf16[128,128], index: 3, kind: input, shape index: {}]   ;;  %s570_s4 = inlined_call_operand.vmem [shape: f32[1,128], index: 4, kind: input, shape index: {}]   ;;  %s571_s5 = inlined_call_operand.hbm [shape: f32[16,128], index: 5, kind: output, shape index: {}]  }
   0x1   :  { %11 = vsyncpa [#allocation6], 0 }
   0x2   :  { %12 = vsyncpa [#allocation4], 0  ;;  %s460_s18 = smov [#allocation5]   ;;  %s366_s22 = scalar_lea.hbm %s567_s1, 512 }
   0x3   :  { %s30_s19 = sshll.u32 %s460_s18, 4  ;;  %p367_p0 = scmp.ne.s32.totalorder %s567_s1, %s366_s22  ;;  %s31_s19 = int_to_ptr.vmem [resolvable:$true] %s30_s19 }
   0x4   :  { %p370_p1 = scmp.lt.u32.totalorder %s366_s22, %s567_s1 }
   0x6   :  { %p372_p2 = pnand %p370_p1, %p367_p0 }
   0x8   :  { %375 = shalt.err (!%p372_p2)
}
   0x9   :  { %s376_s27 = scalar_lea.vmem %s31_s19, 512  ;;  %p381_p4 = scmp.lt.s32.totalorder %s31_s19, %s31_s19 }
   0xa   :  { %p377_p3 = scmp.ne.s32.totalorder %s31_s19, %s376_s27  ;;  %p382_p5 = scmp.lt.s32.totalorder %s376_s27, %s376_s27 }
   0xc   :  { %p383_p6 = por %p382_p5, %p381_p4 }
   0xe   :  { %p384_p7 = pnand %p383_p6, %p377_p3 }
  0x10   :  { %387 = shalt.err (!%p384_p7)
}
  0x11   :  { %s461_s28 = smov 64   ;;  %s462_s29 = smov 4  }
  0x12   :  { %36 = dma.hbm_to_vmem [thread:$0]  %s567_s1, 512, %s31_s19, [#allocation6], %s461_s28, %s461_s28, %s462_s29  }
  0x13   :  { %s463_s7 = smov [#allocation2]   ;;  %s388_s11 = scalar_lea.hbm %s566_s0, 256 }
  0x14   :  { %s18_s8 = sshll.u32 %s463_s7, 4  ;;  %p389_p8 = scmp.ne.s32.totalorder %s566_s0, %s388_s11  ;;  %s19_s8 = int_to_ptr.vmem [resolvable:$true] %s18_s8 }
  0x15   :  { %p392_p9 = scmp.lt.u32.totalorder %s388_s11, %s566_s0 }
  0x17   :  { %p394_p10 = pnand %p392_p9, %p389_p8 }
  0x19   :  { %397 = shalt.err (!%p394_p10)
}
  0x1a   :  { %s398_s16 = scalar_lea.vmem %s19_s8, 256  ;;  %p403_p12 = scmp.lt.s32.totalorder %s19_s8, %s19_s8 }
  0x1b   :  { %p399_p11 = scmp.ne.s32.totalorder %s19_s8, %s398_s16  ;;  %p404_p13 = scmp.lt.s32.totalorder %s398_s16, %s398_s16 }
  0x1d   :  { %p405_p0 = por %p404_p13, %p403_p12 }
  0x1f   :  { %p406_p1 = pnand %p405_p0, %p399_p11 }
  0x21   :  { %409 = shalt.err (!%p406_p1)
}
  0x22   :  { %s464_s1 = smov 128   ;;  %s465_s17 = smov 8  }
  0x23   :  { %24 = dma.hbm_to_vmem [thread:$0]  %s566_s0, 256, %s19_s8, [#allocation3], %s464_s1, %s464_s1, %s465_s17  }
  0x24   :  { %s466_s20 = smov [#allocation7]   ;;  %s410_s24 = scalar_lea.hbm %s569_s3, 1024 }
  0x25   :  { %s44_s21 = sshll.u32 %s466_s20, 4  ;;  %p411_p2 = scmp.ne.s32.totalorder %s569_s3, %s410_s24  ;;  %s45_s21 = int_to_ptr.vmem [resolvable:$true] %s44_s21 }
  0x26   :  { %p414_p3 = scmp.lt.u32.totalorder %s410_s24, %s569_s3 }
  0x28   :  { %p416_p4 = pnand %p414_p3, %p411_p2 }
  0x2a   :  { %419 = shalt.err (!%p416_p4)
}
  0x2b   :  { %s420_s6 = scalar_lea.vmem %s45_s21, 1024  ;;  %p425_p6 = scmp.lt.s32.totalorder %s45_s21, %s45_s21 }
  0x2c   :  { %p421_p5 = scmp.ne.s32.totalorder %s45_s21, %s420_s6  ;;  %p426_p7 = scmp.lt.s32.totalorder %s420_s6, %s420_s6 }
  0x2e   :  { %p427_p8 = por %p426_p7, %p425_p6 }
  0x30   :  { %p428_p9 = pnand %p427_p8, %p421_p5 }
  0x32   :  { %431 = shalt.err (!%p428_p9)
}
  0x33   :  { %50 = dma.hbm_to_vmem [thread:$0]  %s569_s3, 1024, %s45_s21, [#allocation6], %s461_s28, %s461_s28, %s462_s29  }
  0x34   :  { %454 = dma.done.wait [#allocation3], 256  }
  0x35   :  { %455 = vsyncadd [#allocation3], 4294967040 }
  0x36   :  { %456 = dma.done.wait [#allocation6], 1536  }
  0x37   :  { %457 = vsyncadd [#allocation6], 4294965760  ;;  %v467_v0 = vmov 0.0   ;;  %vm468_vm0 = vmmov 0   ;;  %v354_v1 = vld [vmem:[#allocation5] sm:$0xff]   ;;  %v355_v2 = vld [vmem:[#allocation5 + $0x8] sm:$0xff]  }
  0x38   :  { %312 = vmatprep.subr.bf16.mxu0 %v467_v0  ;;  %320 = vmatprep.mubr.msk.bf16.mxu0 %vm468_vm0, %v467_v0  ;;  %v358_v3 = vld [vmem:[#allocation7] sm:$0xff]   ;;  %v356_v4 = vld [vmem:[#allocation5 + $0x10] sm:$0xff]   ;;  %v359_v5 = vld [vmem:[#allocation7 + $0x8] sm:$0xff]   ;;  %vm105_vm1 = vcmask 523264   ;;  %s469_s9 = smov [#allocation8]  }
  0x39   :  { %324 = vmatprep.subr.bf16.mxu1 %v467_v0  ;;  %340 = vmatprep.mubr.msk.bf16.mxu1 %vm468_vm0, %v467_v0  ;;  %v357_v6 = vld [vmem:[#allocation5 + $0x18] sm:$0xff]   ;;  %v63_v7 = vld [vmem:[#allocation2] sm:$0xff]  ;;  %v362_v12 = vld [vmem:[#allocation7 + $0x20] sm:$0xff]   ;;  %s270_s10 = sshll.u32 %s469_s9, 4  ;;  %s271_s10 = int_to_ptr.vmem [resolvable:$true] %s270_s10 }
  0x3a   :  { %313 = vmatpush3.bf16.msra.mxu0 %v354_v1  ;;  %325 = vmatpush3.bf16.msra.mxu1 %v358_v3  ;;  %v64_v8 = vld [vmem:[#allocation2 + $0x8] sm:$0xff]  ;;  %v360_v9 = vld [vmem:[#allocation7 + $0x10] sm:$0xff]   ;;  %v363_v13 = vld [vmem:[#allocation7 + $0x28] sm:$0xff]   ;;  %p437_p11 = scmp.lt.s32.totalorder %s271_s10, %s271_s10 }
  0x3b   :  { %314 = vmatprep.subr.bf16.mxu0 %v467_v0  ;;  %326 = vmatprep.subr.bf16.mxu1 %v467_v0  ;;  %v65_v10 = vpack.c.bf16 %v64_v8, %v63_v7  ;;  %v361_v11 = vld [vmem:[#allocation7 + $0x18] sm:$0xff]   ;;  %v364_v14 = vld [vmem:[#allocation7 + $0x30] sm:$0xff]  }
  0x3c   :  { %v365_v15 = vld [vmem:[#allocation7 + $0x38] sm:$0xff]   ;;  %v283_v16 = vld [vmem:[%s568_s2] ss:$0 sm:$0xff]  ;;  %s432_s2 = scalar_lea.vmem %s271_s10, 256 }
  0x3d   :  { %v289_v24 = vld [vmem:[%s570_s4] ss:$0 sm:$0xff]  ;;  %p433_p10 = scmp.ne.s32.totalorder %s271_s10, %s432_s2  ;;  %p438_p12 = scmp.lt.s32.totalorder %s432_s2, %s432_s2 }
  0x3e   :  { %315 = vmatpush3.bf16.msra.mxu0 %v355_v2  ;;  %327 = vmatpush3.bf16.msra.mxu1 %v359_v5 }
  0x3f   :  { %316 = vmatprep.subr.bf16.mxu0 %v467_v0  ;;  %328 = vmatprep.subr.bf16.mxu1 %v467_v0  ;;  %p439_p13 = por %p438_p12, %p437_p11 }
  0x41   :  { %p440_p0 = pnand %p439_p13, %p433_p10 }
  0x42   :  { %317 = vmatpush3.bf16.msra.mxu0 %v356_v4  ;;  %329 = vmatpush3.bf16.msra.mxu1 %v360_v9 }
  0x43   :  { %318 = vmatprep.subr.bf16.mxu0 %v467_v0  ;;  %330 = vmatprep.subr.bf16.mxu1 %v467_v0 }
  0x46   :  { %319 = vmatpush3.bf16.msra.mxu0 %v357_v6  ;;  %331 = vmatpush3.bf16.msra.mxu1 %v361_v11 }
  0x47   :  { %332 = vmatprep.subr.bf16.mxu1 %v467_v0 }
  0x49   :  { %321 = vmatmul.mubr.msk.bf16.vlgmr.msra.gmra.mrb[0].mxu0 %vm105_vm1, %v65_v10 }
  0x4a   :  { %333 = vmatpush3.bf16.msra.mxu1 %v362_v12 }
  0x4b   :  { %334 = vmatprep.subr.bf16.mxu1 %v467_v0 }
  0x4e   :  { %335 = vmatpush3.bf16.msra.mxu1 %v363_v13 }
  0x4f   :  { %336 = vmatprep.subr.bf16.mxu1 %v467_v0 }
  0x52   :  { %337 = vmatpush3.bf16.msra.mxu1 %v364_v14 }
  0x53   :  { %338 = vmatprep.subr.bf16.mxu1 %v467_v0 }
  0x56   :  { %339 = vmatpush3.bf16.msra.mxu1 %v365_v15 }
 0x11c   :  { %v143_v17 = vpop.f32.mrb[0].mxu0 }
 0x11d   :  { %v322_v18 = vpop.f32.mrb[1].mxu0  ;;  %v144_v20 = vadd.f32 %v283_v16, %v143_v17 }
 0x11e   :  { %v146_v19 = vpop.f32.mrb[2].mxu0 }
 0x11f   :  { %v147_v21 = vadd.f32 %v283_v16, %v146_v19  ;;  %v323_v22 = vpop.f32.mrb[3].mxu0 }
 0x121   :  { %v150_v23 = vpack.c.bf16 %v147_v21, %v144_v20 }
 0x123   :  { %341 = vmatmul.mubr.bf16.vlgmr.msra.gmra.mrb[0].mxu1 %v150_v23 }
 0x1f6   :  { %v256_v25 = vpop.f32.mrb[0].mxu1 }
 0x1f7   :  { %v257_v26 = vadd.f32 %v289_v24, %v256_v25  ;;  %v342_v27 = vpop.f32.mrb[1].mxu1 }
 0x1f8   :  { %v259_v28 = vpop.f32.mrb[2].mxu1 }
 0x1f9   :  { %263 = vst [vmem:[#allocation8] sm:$0xff] %v257_v26  ;;  %v260_v29 = vadd.f32 %v289_v24, %v259_v28  ;;  %v343_v30 = vpop.f32.mrb[3].mxu1 }
 0x1fb   :  { %264 = vst [vmem:[#allocation8 + $0x8] sm:$0xff] %v260_v29 }
 0x1fc   :  { %443 = shalt.err (!%p440_p0)
}
 0x1fd   :  { %s444_s12 = scalar_lea.hbm %s571_s5, 256 }
 0x1fe   :  { %p445_p1 = scmp.ne.s32.totalorder %s571_s5, %s444_s12  ;;  %p448_p2 = scmp.lt.u32.totalorder %s444_s12, %s571_s5 }
 0x200   :  { %p450_p3 = pnand %p448_p2, %p445_p1 }
 0x202   :  { %453 = shalt.err (!%p450_p3)
}
 0x203   :  { %276 = dma.vmem_to_hbm [thread:$0]  %s271_s10, 256, %s571_s5, [#allocation4], %s464_s1, %s464_s1, %s465_s17  }
 0x204   :  { %458 = dma.done.wait [#allocation4], 256  }
 0x205   :  { %459 = vsyncadd [#allocation4], 4294967040 }
 0x206   :  { %280 = vsyncpa [#allocation3], 1 }
 0x207   :  { %281 = vsyncpa [#allocation6], 1 }
 0x208   :  { %282 = vsyncpa [#allocation4], 1 }

</bundles_post_ra>
